<compile_context>
chip_gen: v6e
topology: v6e:2x2x1
jax: 0.10.0
libtpu: 0.0.40
codegen_flags: <defaults>
</compile_context>

<pallas_src>
import math

import jax
import jax.numpy as jnp
from jax.experimental import pallas as pl
from jax.experimental.pallas import tpu as pltpu

EPS = 1e-6


def _choose_tiles(n_rows, spatial, itemsize,
                  target_block_bytes=2 << 20, vmem_budget_bytes=10 << 20):
    """Pick (row_tile, spatial_tile) for the flattened (n_rows, spatial) view."""
    # Spatial tile: keep the full spatial extent per block unless even a
    # 128-row block would blow the per-block budget; then reduce across
    # 2048-lane spatial tiles using the VMEM accumulator.
    if 128 * spatial * itemsize <= target_block_bytes:
        s_tile = spatial
    else:
        s_tile = 2048                                  # multiple of 128
    # Row tile: as many rows as fit (a) the per-block budget and (b) a
    # conservative total-VMEM budget counting the double-buffered input block
    # plus the lane-padded (R, 1) output blocks and f32 accumulator scratch.
    per_row_bytes = 2 * s_tile * itemsize + 3 * 128 * 4
    r = min(target_block_bytes // (s_tile * itemsize),
            vmem_budget_bytes // per_row_bytes,
            8192)
    r = max(128, (r // 128) * 128)                     # lane/sublane aligned
    if n_rows <= r:                                    # single row tile covers all
        r = max(8, ((n_rows + 7) // 8) * 8)
    return int(r), int(s_tile)


def _int_pow(x, n):
    """x ** n for positive Python int n, via squaring on the VPU."""
    result = None
    base = x
    while n > 0:
        if n & 1:
            result = base if result is None else result * base
        n >>= 1
        if n:
            base = base * base
    return result


def _make_gem_kernel(*, spatial, s_tile, p_static, eps, mask_spatial_tail):
    log_hw = math.log(float(spatial))

    def kernel(p_ref, x_ref, o_ref, acc_ref):
        k = pl.program_id(1)                           # spatial (reduction) axis

        @pl.when(k == 0)
        def _init():
            acc_ref[...] = jnp.zeros_like(acc_ref)

        x = x_ref[...].astype(jnp.float32)
        x = jnp.maximum(x, eps)                        # clamp(min=eps) -> x > 0

        if p_static is not None:                       # VPU fast path: mul chain
            xp = _int_pow(x, int(p_static))
        else:                                          # general learnable p
            xp = jnp.exp(p_ref[0] * jnp.log(x))        # x ** p, x strictly positive

        if mask_spatial_tail:                          # zero padded spatial columns
            col = k * s_tile + jax.lax.broadcasted_iota(jnp.int32, xp.shape, 1)
            xp = jnp.where(col < spatial, xp, 0.0)

        acc_ref[...] += jnp.sum(xp, axis=-1, keepdims=True)

        @pl.when(k == pl.num_programs(1) - 1)
        def _finalize():
            s = acc_ref[...]                           # (R, 1) f32 spatial sum
            if p_static is not None:
                inv_p = 1.0 / float(p_static)
            else:
                inv_p = 1.0 / p_ref[0]
            # mean ** (1/p) == exp(inv_p * (log(sum) - log(H*W)))
            o_ref[...] = jnp.exp(inv_p * (jnp.log(s) - log_hw)).astype(o_ref.dtype)

    return kernel


def gem_forward(x, p, *, p_static=None, eps=EPS):
    """GeM pooling. x: (B, C, H, W); p: (1,) learnable exponent. Returns (B, C).

    If `p_static` is a positive Python int matching the value stored in `p`,
    the per-element power uses VPU multiplies instead of the EUP exp/log pair.
    """
    if p_static is not None:
        p_static = int(p_static)
        assert p_static >= 1, "p_static must be a positive integer"
    B, C, H, W = x.shape
    N, S = B * C, H * W
    x_flat = x.reshape(N, S)                           # free reshape, no transpose
    p_arr = jnp.asarray(p, jnp.float32).reshape((1,))

    itemsize = jnp.dtype(x.dtype).itemsize
    R, s_tile = _choose_tiles(N, S, itemsize)
    grid = (pl.cdiv(N, R), pl.cdiv(S, s_tile))
    mask_spatial_tail = (S % s_tile) != 0

    kernel = _make_gem_kernel(spatial=S, s_tile=s_tile, p_static=p_static,
                              eps=eps, mask_spatial_tail=mask_spatial_tail)

    if p_static is not None:
        flops = (1 + p_static) * N * S                 # clamp + muls + add
        transcendentals = 2 * N                        # final log/exp per output
    else:
        flops = 3 * N * S
        transcendentals = 2 * N * S + 2 * N
    cost = pl.CostEstimate(
        flops=int(flops),
        transcendentals=int(transcendentals),
        bytes_accessed=int(N * S * itemsize + N * itemsize + 4),
    )

    y = pl.pallas_call(
        kernel,
        out_shape=jax.ShapeDtypeStruct((N, 1), x.dtype),
        grid_spec=pltpu.PrefetchScalarGridSpec(
            num_scalar_prefetch=0,
            grid=grid,
            in_specs=[
                pl.BlockSpec(memory_space=pltpu.MemorySpace.SMEM),   # p (scalar)
                pl.BlockSpec((R, s_tile), lambda i, k: (i, k)),      # x row tiles
            ],
            out_specs=pl.BlockSpec((R, 1), lambda i, k: (i, 0)),     # per-row GeM
            scratch_shapes=[pltpu.VMEM((R, 1), jnp.float32)],        # spatial acc
        ),
        compiler_params=pltpu.CompilerParams(
            dimension_semantics=("parallel", "arbitrary")),
        cost_estimate=cost,
    )(p_arr, x_flat)

    return y.reshape(B, C)


def gem_reference(x, p):
    """Pure-JAX reference mirroring the PyTorch module."""
    xc = jnp.maximum(x, EPS)
    pooled = jnp.mean(xc ** p[0], axis=(-2, -1))
    return (pooled ** (1.0 / p[0])).astype(x.dtype)


def _check(name, out, ref, rtol=1e-4, atol=1e-5):
    assert out.shape == ref.shape, (name, out.shape, ref.shape)
    assert jnp.allclose(out, ref, rtol=rtol, atol=atol), (name, out, ref)


if __name__ == "__main__":
    keys = jax.random.split(jax.random.PRNGKey(0), 3)
    # Parameter init matches nn.Parameter(torch.ones(1) * p) with p = 3.
    p_param = jnp.ones((1,), dtype=jnp.float32) * 3.0

    # (1) Module-spec shape: general runtime-p path and static-int-p fast path.
    B, C, H, W = 2, 4, 16, 16
    x = jax.random.normal(keys[0], (B, C, H, W), dtype=jnp.float32)
    ref = gem_reference(x, p_param)
    out = jax.block_until_ready(gem_forward(x, p_param))
    _check("general", out, ref)
    out_fast = jax.block_until_ready(gem_forward(x, p_param, p_static=3))
    _check("static_p", out_fast, ref)

    # (2) Larger spatial extent: exercises the spatial-reduction grid axis,
    #     the VMEM accumulator and the spatial tail mask (72*72 = 5184 > 4096).
    x2 = jax.random.normal(keys[1], (2, 8, 72, 72), dtype=jnp.float32)
    out2 = jax.block_until_ready(gem_forward(x2, p_param))
    _check("spatial_tiled", out2, gem_reference(x2, p_param))

    # (3) Row count (B*C = 150) not a multiple of 8: exercises ragged row tiles.
    x3 = jax.random.normal(keys[2], (3, 50, 7, 7), dtype=jnp.float32)
    out3 = jax.block_until_ready(gem_forward(x3, p_param))
    _check("ragged_rows", out3, gem_reference(x3, p_param))

    print("KERNEL_OK")
</pallas_src>

<mosaic_0001>
module attributes {stable_mosaic.version = 11 : i64} {
  func.func @kernel(%arg0: i32, %arg1: i32, %arg2: memref<1xf32, #tpu.memory_space<smem>>, %arg3: memref<8x256xf32, #tpu.memory_space<vmem>>, %arg4: memref<8x1xf32, #tpu.memory_space<vmem>>, %arg5: memref<8x1xf32, #tpu.memory_space<vmem>>) attributes {dimension_semantics = [#tpu.dimension_semantics<parallel>, #tpu.dimension_semantics<arbitrary>], iteration_bounds = array<i64: 1, 1>, scalar_prefetch = 0 : i64, scratch_operands = 1 : i64, tpu.core_type = #tpu.core_type<tc>, window_params = [{transform_indices = @transform_0, window_bounds = array<i64: 1>}, {transform_indices = @transform_1, window_bounds = array<i64: 8, 256>}, {transform_indices = @transform_2, window_bounds = array<i64: 8, 1>}]} {
    %c0_i32 = arith.constant 0 : i32
    %0 = arith.cmpi eq, %arg1, %c0_i32 : i32
    %1 = arith.extui %0 : i1 to i32
    %c0_i32_0 = arith.constant 0 : i32
    %2 = arith.cmpi ne, %1, %c0_i32_0 : i32
    scf.if %2 {
      %cst_10 = arith.constant 0.000000e+00 : f32
      %19 = vector.broadcast %cst_10 : f32 to vector<8x1xf32>
      %c0_11 = arith.constant 0 : index
      %c0_12 = arith.constant 0 : index
      %20 = vector.load %arg5[%c0_11, %c0_12] : memref<8x1xf32, #tpu.memory_space<vmem>>, vector<8x1xf32>
      tpu.vector_store %arg5[%c0_11, %c0_12], %19 {strides = array<i32>} : memref<8x1xf32, #tpu.memory_space<vmem>>, vector<8x1xf32>,
    } else {
    }
    %c0 = arith.constant 0 : index
    %c0_1 = arith.constant 0 : index
    %3 = vector.load %arg3[%c0, %c0_1] : memref<8x256xf32, #tpu.memory_space<vmem>>, vector<8x256xf32>
    %cst = arith.constant 9.99999997E-7 : f32
    %4 = vector.broadcast %cst : f32 to vector<8x256xf32>
    %5 = arith.maximumf %3, %4 : vector<8x256xf32>
    %c0_2 = arith.constant 0 : index
    %6 = memref.load %arg2[%c0_2] : memref<1xf32, #tpu.memory_space<smem>>
    %7 = math.log %5 : vector<8x256xf32>
    %8 = vector.broadcast %6 : f32 to vector<8x256xf32>
    %9 = arith.mulf %8, %7 : vector<8x256xf32>
    %10 = math.exp %9 : vector<8x256xf32>
    %c0_3 = arith.constant 0 : index
    %c0_4 = arith.constant 0 : index
    %11 = vector.load %arg5[%c0_3, %c0_4] : memref<8x1xf32, #tpu.memory_space<vmem>>, vector<8x1xf32>
    %cst_5 = arith.constant dense<0.000000e+00> : vector<8xf32>
    %12 = vector.multi_reduction <add>, %10, %cst_5 [1] : vector<8x256xf32> to vector<8xf32>
    %13 = vector.shape_cast %12 : vector<8xf32> to vector<8x1xf32>
    %14 = arith.addf %11, %13 : vector<8x1xf32>
    %c0_6 = arith.constant 0 : index
    %c0_7 = arith.constant 0 : index
    %15 = vector.load %arg5[%c0_6, %c0_7] : memref<8x1xf32, #tpu.memory_space<vmem>>, vector<8x1xf32>
    tpu.vector_store %arg5[%c0_6, %c0_7], %14 {strides = array<i32>} : memref<8x1xf32, #tpu.memory_space<vmem>>, vector<8x1xf32>,
    %c0_i32_8 = arith.constant 0 : i32
    %16 = arith.cmpi eq, %arg1, %c0_i32_8 : i32
    %17 = arith.extui %16 : i1 to i32
    %c0_i32_9 = arith.constant 0 : i32
    %18 = arith.cmpi ne, %17, %c0_i32_9 : i32
    scf.if %18 {
      %c0_10 = arith.constant 0 : index
      %c0_11 = arith.constant 0 : index
      %19 = vector.load %arg5[%c0_10, %c0_11] : memref<8x1xf32, #tpu.memory_space<vmem>>, vector<8x1xf32>
      %c0_12 = arith.constant 0 : index
      %20 = memref.load %arg2[%c0_12] : memref<1xf32, #tpu.memory_space<smem>>
      %cst_13 = arith.constant 1.000000e+00 : f32
      %21 = arith.divf %cst_13, %20 : f32
      %22 = math.log %19 : vector<8x1xf32>
      %cst_14 = arith.constant 5.54517746 : f32
      %23 = vector.broadcast %cst_14 : f32 to vector<8x1xf32>
      %24 = arith.subf %22, %23 : vector<8x1xf32>
      %25 = vector.broadcast %21 : f32 to vector<8x1xf32>
      %26 = arith.mulf %25, %24 : vector<8x1xf32>
      %27 = math.exp %26 : vector<8x1xf32>
      %c0_15 = arith.constant 0 : index
      %c0_16 = arith.constant 0 : index
      %28 = vector.load %arg4[%c0_15, %c0_16] : memref<8x1xf32, #tpu.memory_space<vmem>>, vector<8x1xf32>
      tpu.vector_store %arg4[%c0_15, %c0_16], %27 {strides = array<i32>} : memref<8x1xf32, #tpu.memory_space<vmem>>, vector<8x1xf32>,
    } else {
    }
    return
  }
  func.func @transform_0(%arg0: i32, %arg1: i32) -> i32 {
    %c0_i32 = arith.constant 0 : i32
    %c0_i32_0 = arith.constant 0 : i32
    return %c0_i32 : i32
  }
  func.func @transform_1(%arg0: i32, %arg1: i32) -> (i32, i32) {
    %c0_i32 = arith.constant 0 : i32
    return %arg0, %arg1 : i32, i32
  }
  func.func @transform_2(%arg0: i32, %arg1: i32) -> (i32, i32) {
    %c0_i32 = arith.constant 0 : i32
    %c0_i32_0 = arith.constant 0 : i32
    return %arg0, %c0_i32 : i32, i32
  }
}

</mosaic_0001>

<bundles_post_ra>
// kernel: tpu_custom_call.1
= control target key start
LH: loop header
LB: loop body
LE: loop exit
PB: predicated region body
PF: predicated region fallthrough
CT: control target
= control target key end

     0   :  { %8 = vsyncpa [#allocation5], 0  ;;  %s115_s9 = smov [#allocation4]   ;;  %s144_s0 = inlined_call_operand.<no memory space> [shape: f32[1], index: 0, kind: input, shape index: {}]   ;;  %s145_s1 = inlined_call_operand.hbm [shape: f32[8,256], index: 1, kind: input, shape index: {}]   ;;  %s146_s2 = inlined_call_operand.vmem [shape: f32[8,1], index: 2, kind: output, shape index: {}]  }
   0x1   :  { %s17_s10 = sshll.u32 %s115_s9, 4  ;;  %s18_s10 = int_to_ptr.vmem [resolvable:$true] %s17_s10 }
   0x2   :  { %s101_s11 = scalar_lea.vmem %s18_s10, 256  ;;  %p106_p1 = scmp.lt.s32.totalorder %s18_s10, %s18_s10 }
   0x3   :  { %p102_p0 = scmp.ne.s32.totalorder %s18_s10, %s101_s11  ;;  %p107_p2 = scmp.lt.s32.totalorder %s101_s11, %s101_s11 }
   0x5   :  { %p108_p3 = por %p107_p2, %p106_p1 }
   0x7   :  { %p109_p4 = pnand %p108_p3, %p102_p0 }
   0x9   :  { %112 = shalt.err (!%p109_p4)
}
   0xa   :  { %20 = dma.hbm_to_vmem [thread:$0]  %s145_s1, 256, %s18_s10, [#allocation5]  }
   0xb   :  { %113 = dma.done.wait [#allocation5], 256  }
   0xc   :  { %114 = vsyncadd [#allocation5], 4294967040  ;;  %vm28_vm0 = vcmask 7168   ;;  %v39_v0 = vstv %s144_s0  ;;  %v116_v1 = vmov 0.0   ;;  %v30_v2 = vld [vmem:[#allocation4] sm:$0xff]  ;;  %v31_v3 = vld [vmem:[#allocation4 + $0x8] sm:$0xff] }
   0xd   :  { %29 = vst.msk [vmem:[#allocation2] sm:$0xff] %vm28_vm0, %v116_v1  ;;  %79 = vrcp.f32 %v39_v0  ;;  %v32_v4 = vmax.f32 %v30_v2, 1e-06  ;;  %v33_v5 = vmax.f32 %v31_v3, 1e-06 }
   0xf   :  { %81 = vlog2.f32 %v32_v4 }
  0x10   :  { %83 = vlog2.f32 %v33_v5 }
  0x14   :  { %v46_v18 = vld [vmem:[#allocation2] sm:$0xff] }
  0x1a   :  { %v80_v6 = vpop.eup %79 }
  0x1b   :  { %75 = vpush %v80_v6 }
  0x1c   :  { %v82_v7 = vpop.eup %81 }
  0x1d   :  { %v84_v8 = vpop.eup %83  ;;  %v36_v9 = vmul.f32 0.6931472, %v82_v7 }
  0x1e   :  { %v38_v10 = vmul.f32 0.6931472, %v84_v8 }
  0x1f   :  { %v40_v11 = vmul.f32 %v39_v0, %v36_v9 }
  0x20   :  { %v41_v12 = vmul.f32 %v39_v0, %v38_v10 }
  0x21   :  { %v42_v13 = vmul.f32 1.442695, %v40_v11 }
  0x22   :  { %v44_v14 = vmul.f32 1.442695, %v41_v12 }
  0x23   :  { %85 = vpow2.f32 %v42_v13 }
  0x24   :  { %87 = vpow2.f32 %v44_v14 }
  0x30   :  { %v86_v15 = vpop.eup %85 }
  0x31   :  { %v88_v16 = vpop.eup %87 }
  0x32   :  { %v47_v17 = vadd.f32 %v88_v16, %v86_v15 }
  0x34   :  { %48 = vadd.xlane.f32.xlu0 %v47_v17 }
  0x4c   :  { %s76_s0 = spop %75 }
  0x4d   :  { %v64_v24 = vstv %s76_s0 }
  0xbd   :  { %v49_v19 = vpop.xlane.xlu0 %48 }
  0xbe   :  { %v50_v20 = vadd.f32 %v49_v19, %v46_v18 }
  0xc0   :  { %52 = vst.msk [vmem:[#allocation2] sm:$0xff] %vm28_vm0, %v50_v20 }
  0xc7   :  { %v56_v21 = vld [vmem:[#allocation2] sm:$0xff] }
  0xc8   :  { %89 = vlog2.f32 %v56_v21 }
  0xd5   :  { %v90_v22 = vpop.eup %89 }
  0xd6   :  { %v62_v23 = vmul.f32 0.6931472, %v90_v22 }
  0xd8   :  { %v74_v25 = vadd.f32 -5.5451775, %v62_v23 }
  0xda   :  { %v65_v26 = vmul.f32 %v74_v25, %v64_v24 }
  0xdc   :  { %v66_v27 = vmul.f32 1.442695, %v65_v26 }
  0xde   :  { %91 = vpow2.f32 %v66_v27 }
  0xeb   :  { %v92_v28 = vpop.eup %91 }
  0xec   :  { %68 = vst.msk [vmem:[%s146_s2] sm:$0xff] %vm28_vm0, %v92_v28 }
  0xed   :  { %73 = vsyncpa [#allocation5], 1 }

</bundles_post_ra>
